<compile_context>
chip_gen: v6e
topology: v6e:2x2x1
jax: 0.10.0
libtpu: 0.0.40
codegen_flags: <defaults>
</compile_context>

<pallas_src>
import functools

import jax
import jax.numpy as jnp
from jax.experimental import pallas as pl
from jax.experimental.pallas import tpu as pltpu


def _round_up(a, b):
    return ((a + b - 1) // b) * b


def _patch_embed_kernel(x_ref, w_ref, c_ref, o_ref, *, eps, e_true):
    # x_ref: (TM, K)   streaming patch rows (true K, no lane padding)
    # w_ref: (K, Ep)   resident projection weight, E zero-padded to Ep
    # c_ref: (3, Ep)   f32 rows: [bias, gamma, beta], E zero-padded to Ep
    # o_ref: (TM, Ep)
    acc = jnp.dot(x_ref[...], w_ref[...], preferred_element_type=jnp.float32)
    consts = c_ref[...]                       # (3, Ep) f32
    acc = acc + consts[0:1, :]                # bias

    # Padded E lanes of `acc` are exact zeros (zero weight columns + zero
    # bias), so plain row sums already give masked statistics over the true
    # embed dim; var = E[x^2] - mean^2 avoids any iota/where mask entirely.
    inv_e = 1.0 / float(e_true)
    mean = jnp.sum(acc, axis=-1, keepdims=True) * inv_e
    ex2 = jnp.sum(acc * acc, axis=-1, keepdims=True) * inv_e
    var = jnp.maximum(ex2 - mean * mean, 0.0)

    normed = (acc - mean) * jax.lax.rsqrt(var + eps)
    out = normed * consts[1:2, :] + consts[2:3, :]   # gamma / beta (0 on pad lanes)
    o_ref[...] = out.astype(o_ref.dtype)


def patch_embed_forward(x, proj_w, proj_b, ln_gamma, ln_beta, *,
                        patch_size, eps=1e-5, tm=512,
                        compute_dtype=None, out_dtype=None,
                        output_layout="NCHW", min_grid_steps=8,
                        vmem_budget_bytes=40 * 1024 * 1024,
                        vmem_limit_bytes=48 * 1024 * 1024):
    """Forward pass of PatchEmbed (Conv2d stride=p projection + LayerNorm).

    x:        (B, C, H, W)  NCHW, like PyTorch
    proj_w:   (E, C, p, p)  conv weight
    proj_b:   (E,)          conv bias
    ln_gamma: (E,)          LayerNorm weight
    ln_beta:  (E,)          LayerNorm bias
    compute_dtype: optional matmul operand dtype (bf16 is MXU-native on all
                   TPU generations incl. v5e); accumulation + LayerNorm are f32.
    out_dtype:     optional output dtype (e.g. bf16 when the net runs in bf16).
    output_layout: "NCHW" (module semantics, default), "NHWC", or "tokens"
                   ((B, H'*W', E)) to skip the final transpose for consumers
                   that don't need NCHW.
    """
    B, C, H, W = x.shape
    E = proj_w.shape[0]
    p = patch_size
    assert H % p == 0 and W % p == 0
    Hp, Wp = H // p, W // p
    K = C * p * p
    M = B * Hp * Wp

    in_dtype = compute_dtype if compute_dtype is not None else x.dtype
    out_dtype = out_dtype if out_dtype is not None else x.dtype
    in_bytes = jnp.dtype(in_dtype).itemsize
    out_bytes = jnp.dtype(out_dtype).itemsize

    # im2col in the wrapper: cast FIRST (so any rearrangement pass moves the
    # narrow dtype), then (B,C,Hp,p,Wp,p) -> (B,Hp,Wp,C,p,p) -> (M, K) to
    # match the Conv2d weight layout.  allow_input_fusion below lets XLA fuse
    # this producer into the pallas_call input DMA instead of materializing it.
    patches = (x.astype(in_dtype)
               .reshape(B, C, Hp, p, Wp, p)
               .transpose(0, 2, 4, 1, 3, 5)
               .reshape(M, K))

    # Resident operands: lane-dense Ep (multiple of 128) so MXU columns and
    # output stores are full-width.  These are tiny, so padding them is free;
    # the streaming LHS keeps its true K (no inflated HBM reads).
    Ep = _round_up(E, 128)
    w_mat = proj_w.reshape(E, K).T.astype(in_dtype)          # (K, E)
    if Ep != E:
        w_mat = jnp.pad(w_mat, ((0, 0), (0, Ep - E)))
    consts = jnp.stack([proj_b, ln_gamma, ln_beta]).astype(jnp.float32)  # (3, E)
    if Ep != E:
        consts = jnp.pad(consts, ((0, 0), (0, Ep - E)))

    # --- row-tile selection -------------------------------------------------
    # Align to sublane packing for the operand dtype (8 rows f32, 16 rows bf16).
    row_align = max(8, (8 * 4) // in_bytes)
    tm = max(row_align, _round_up(min(tm, _round_up(M, row_align)), row_align))

    # Keep >= min_grid_steps grid steps when possible so the "parallel" M axis
    # can shard across both v7x TensorCores (and keeps the pipeline busy).
    if min_grid_steps > 1:
        cap = (M // min_grid_steps) // row_align * row_align
        tm = min(tm, max(cap, row_align))

    # Conservative VMEM footprint (double-buffered streams + resident weight +
    # ~3 simultaneously-live f32 intermediates); shrink tm until it fits.
    def _footprint(t):
        return (2 * t * K * in_bytes          # streaming patch tile
                + 2 * t * Ep * out_bytes      # streaming output tile
                + 2 * K * Ep * in_bytes       # resident weight (double-buffered)
                + 2 * 3 * Ep * 4              # bias/gamma/beta rows
                + 3 * t * Ep * 4)             # live f32 intermediates (acc/centered/normed)

    while _footprint(tm) > vmem_budget_bytes and tm > row_align:
        tm = max(row_align, (tm // 2) // row_align * row_align)

    grid = (pl.cdiv(M, tm),)   # partial last block is fine: rows are independent

    out_flat = pl.pallas_call(
        functools.partial(_patch_embed_kernel, eps=eps, e_true=E),
        out_shape=jax.ShapeDtypeStruct((M, Ep), out_dtype),
        grid_spec=pltpu.PrefetchScalarGridSpec(
            num_scalar_prefetch=0,
            grid=grid,
            in_specs=[
                pl.BlockSpec((tm, K), lambda i: (i, 0)),    # streaming patch tile
                pl.BlockSpec((K, Ep), lambda i: (0, 0)),    # resident weight
                pl.BlockSpec((3, Ep), lambda i: (0, 0)),    # bias/gamma/beta
            ],
            out_specs=pl.BlockSpec((tm, Ep), lambda i: (i, 0)),
        ),
        compiler_params=pltpu.CompilerParams(
            dimension_semantics=("parallel",),
            allow_input_fusion=[True, False, False],
            vmem_limit_bytes=vmem_limit_bytes,
        ),
    )(patches, w_mat, consts)

    tokens = out_flat[:, :E]                      # (M, E)
    if output_layout == "tokens":
        return tokens.reshape(B, Hp * Wp, E)
    if output_layout == "NHWC":
        return tokens.reshape(B, Hp, Wp, E)
    # Default: NCHW, matching the PyTorch module.
    return tokens.reshape(B, Hp, Wp, E).transpose(0, 3, 1, 2)


def _reference_forward(x, proj_w, proj_b, ln_gamma, ln_beta, *, patch_size, eps=1e-5):
    """Pure-JAX reference mirroring the PyTorch module."""
    y = jax.lax.conv_general_dilated(
        x, proj_w,
        window_strides=(patch_size, patch_size),
        padding="VALID",
        dimension_numbers=("NCHW", "OIHW", "NCHW"),
    ) + proj_b[None, :, None, None]
    B, C, H, W = y.shape
    t = y.reshape(B, C, H * W).transpose(0, 2, 1)  # (B, N, C)
    mean = jnp.mean(t, axis=-1, keepdims=True)
    var = jnp.mean((t - mean) ** 2, axis=-1, keepdims=True)
    t = (t - mean) * jax.lax.rsqrt(var + eps) * ln_gamma + ln_beta
    return t.reshape(B, H, W, C).transpose(0, 3, 1, 2)


if __name__ == "__main__":
    # Small shapes consistent with the module.
    B, C_in, H, W = 2, 4, 16, 16
    patch_size = 4
    embed_dim = 32

    key = jax.random.PRNGKey(0)
    k1, k2, k3, k4, k5 = jax.random.split(key, 5)

    x = jax.random.normal(k1, (B, C_in, H, W), dtype=jnp.float32)
    proj_w = 0.05 * jax.random.normal(
        k2, (embed_dim, C_in, patch_size, patch_size), dtype=jnp.float32)
    proj_b = 0.01 * jax.random.normal(k3, (embed_dim,), dtype=jnp.float32)
    ln_gamma = 1.0 + 0.02 * jax.random.normal(k4, (embed_dim,), dtype=jnp.float32)
    ln_beta = 0.02 * jax.random.normal(k5, (embed_dim,), dtype=jnp.float32)

    ref = _reference_forward(x, proj_w, proj_b, ln_gamma, ln_beta,
                             patch_size=patch_size)

    # f32 operands (accurate path, all generations).
    out = patch_embed_forward(x, proj_w, proj_b, ln_gamma, ln_beta,
                              patch_size=patch_size)
    out = jax.block_until_ready(out)
    assert out.shape == (B, embed_dim, H // patch_size, W // patch_size)
    assert jnp.allclose(out, ref, atol=1e-4, rtol=1e-4), "f32 mismatch vs reference"

    # bf16 operands (MXU-native on all gens incl. v5e); accumulation + LN in f32.
    out_bf16 = patch_embed_forward(x, proj_w, proj_b, ln_gamma, ln_beta,
                                   patch_size=patch_size,
                                   compute_dtype=jnp.bfloat16)
    out_bf16 = jax.block_until_ready(out_bf16)
    assert jnp.allclose(out_bf16, ref, atol=1e-1, rtol=1e-1), "bf16 mismatch vs reference"

    # Token layout path (skips the output NCHW transpose) — same values.
    out_tok = patch_embed_forward(x, proj_w, proj_b, ln_gamma, ln_beta,
                                  patch_size=patch_size, output_layout="tokens")
    out_tok = jax.block_until_ready(out_tok)
    Hp, Wp = H // patch_size, W // patch_size
    assert jnp.allclose(
        out_tok.reshape(B, Hp, Wp, embed_dim).transpose(0, 3, 1, 2),
        ref, atol=1e-4, rtol=1e-4), "token layout mismatch vs reference"

    print("KERNEL_OK")
</pallas_src>

<mosaic_0001>
module attributes {stable_mosaic.version = 11 : i64} {
  func.func @_patch_embed_kernel(%arg0: i32, %arg1: memref<8x64xf32, #tpu.memory_space<vmem>>, %arg2: memref<64x128xf32, #tpu.memory_space<vmem>>, %arg3: memref<3x128xf32, #tpu.memory_space<vmem>>, %arg4: memref<8x128xf32, #tpu.memory_space<vmem>>) attributes {dimension_semantics = [#tpu.dimension_semantics<parallel>], iteration_bounds = array<i64: 4>, scalar_prefetch = 0 : i64, scratch_operands = 0 : i64, tpu.core_type = #tpu.core_type<tc>, window_params = [{transform_indices = @transform_0, window_bounds = array<i64: 8, 64>}, {pipeline_mode = #tpu.pipeline_mode<synchronous>, transform_indices = @transform_1, window_bounds = array<i64: 64, 128>}, {pipeline_mode = #tpu.pipeline_mode<synchronous>, transform_indices = @transform_2, window_bounds = array<i64: 3, 128>}, {transform_indices = @transform_3, window_bounds = array<i64: 8, 128>}]} {
    %c0 = arith.constant 0 : index
    %c0_0 = arith.constant 0 : index
    %0 = vector.load %arg1[%c0, %c0_0] : memref<8x64xf32, #tpu.memory_space<vmem>>, vector<8x64xf32>
    %c0_1 = arith.constant 0 : index
    %c0_2 = arith.constant 0 : index
    %1 = vector.load %arg2[%c0_1, %c0_2] : memref<64x128xf32, #tpu.memory_space<vmem>>, vector<64x128xf32>
    %cst = arith.constant dense<0.000000e+00> : vector<8x128xf32>
    %2 = tpu.matmul %0, %1, %cst {dimension_numbers = #tpu.dot_dimension_numbers<[1], [0], [0], [1], [0, 0, 1, 1], [], []>} : vector<8x64xf32>, vector<64x128xf32>, vector<8x128xf32> -> vector<8x128xf32>
    %c0_3 = arith.constant 0 : index
    %c0_4 = arith.constant 0 : index
    %3 = vector.load %arg3[%c0_3, %c0_4] : memref<3x128xf32, #tpu.memory_space<vmem>>, vector<3x128xf32>
    %4 = vector.extract_strided_slice %3 {offsets = [0, 0], sizes = [1, 128], strides = [1, 1]} : vector<3x128xf32> to vector<1x128xf32>
    %5 = vector.broadcast %4 : vector<1x128xf32> to vector<8x128xf32>
    %6 = arith.addf %2, %5 : vector<8x128xf32>
    %cst_5 = arith.constant dense<0.000000e+00> : vector<8xf32>
    %7 = vector.multi_reduction <add>, %6, %cst_5 [1] : vector<8x128xf32> to vector<8xf32>
    %8 = vector.shape_cast %7 : vector<8xf32> to vector<8x1xf32>
    %cst_6 = arith.constant 3.125000e-02 : f32
    %9 = vector.broadcast %cst_6 : f32 to vector<8x1xf32>
    %10 = arith.mulf %8, %9 : vector<8x1xf32>
    %11 = arith.mulf %6, %6 : vector<8x128xf32>
    %cst_7 = arith.constant dense<0.000000e+00> : vector<8xf32>
    %12 = vector.multi_reduction <add>, %11, %cst_7 [1] : vector<8x128xf32> to vector<8xf32>
    %13 = vector.shape_cast %12 : vector<8xf32> to vector<8x1xf32>
    %cst_8 = arith.constant 3.125000e-02 : f32
    %14 = vector.broadcast %cst_8 : f32 to vector<8x1xf32>
    %15 = arith.mulf %13, %14 : vector<8x1xf32>
    %16 = arith.mulf %10, %10 : vector<8x1xf32>
    %17 = arith.subf %15, %16 : vector<8x1xf32>
    %cst_9 = arith.constant 0.000000e+00 : f32
    %18 = vector.broadcast %cst_9 : f32 to vector<8x1xf32>
    %19 = arith.maximumf %17, %18 : vector<8x1xf32>
    %20 = vector.broadcast %10 : vector<8x1xf32> to vector<8x128xf32>
    %21 = arith.subf %6, %20 : vector<8x128xf32>
    %cst_10 = arith.constant 9.99999974E-6 : f32
    %22 = vector.broadcast %cst_10 : f32 to vector<8x1xf32>
    %23 = arith.addf %19, %22 : vector<8x1xf32>
    %24 = math.rsqrt %23 : vector<8x1xf32>
    %25 = vector.broadcast %24 : vector<8x1xf32> to vector<8x128xf32>
    %26 = arith.mulf %21, %25 : vector<8x128xf32>
    %27 = vector.extract_strided_slice %3 {offsets = [1, 0], sizes = [1, 128], strides = [1, 1]} : vector<3x128xf32> to vector<1x128xf32>
    %28 = vector.broadcast %27 : vector<1x128xf32> to vector<8x128xf32>
    %29 = arith.mulf %26, %28 : vector<8x128xf32>
    %30 = vector.extract_strided_slice %3 {offsets = [2, 0], sizes = [1, 128], strides = [1, 1]} : vector<3x128xf32> to vector<1x128xf32>
    %31 = vector.broadcast %30 : vector<1x128xf32> to vector<8x128xf32>
    %32 = arith.addf %29, %31 : vector<8x128xf32>
    %c0_11 = arith.constant 0 : index
    %c0_12 = arith.constant 0 : index
    %33 = vector.load %arg4[%c0_11, %c0_12] : memref<8x128xf32, #tpu.memory_space<vmem>>, vector<8x128xf32>
    tpu.vector_store %arg4[%c0_11, %c0_12], %32 {strides = array<i32>} : memref<8x128xf32, #tpu.memory_space<vmem>>, vector<8x128xf32>,
    return
  }
  func.func @transform_0(%arg0: i32) -> (i32, i32) {
    %c0_i32 = arith.constant 0 : i32
    %c0_i32_0 = arith.constant 0 : i32
    return %arg0, %c0_i32 : i32, i32
  }
  func.func @transform_1(%arg0: i32) -> (i32, i32) {
    %c0_i32 = arith.constant 0 : i32
    %c0_i32_0 = arith.constant 0 : i32
    %c0_i32_1 = arith.constant 0 : i32
    return %c0_i32, %c0_i32_0 : i32, i32
  }
  func.func @transform_2(%arg0: i32) -> (i32, i32) {
    %c0_i32 = arith.constant 0 : i32
    %c0_i32_0 = arith.constant 0 : i32
    %c0_i32_1 = arith.constant 0 : i32
    return %c0_i32, %c0_i32_0 : i32, i32
  }
  func.func @transform_3(%arg0: i32) -> (i32, i32) {
    %c0_i32 = arith.constant 0 : i32
    %c0_i32_0 = arith.constant 0 : i32
    return %arg0, %c0_i32 : i32, i32
  }
}

</mosaic_0001>

<bundles_post_ra>
// kernel: tpu_custom_call.1
= control target key start
LH: loop header
LB: loop body
LE: loop exit
PB: predicated region body
PF: predicated region fallthrough
CT: control target
= control target key end

     0   :  { %8 = vsyncpa [#allocation3], 0  ;;  %s892_s0 = inlined_call_operand.hbm [shape: f32[32,64], index: 0, kind: input, shape index: {}]   ;;  %s893_s1 = inlined_call_operand.hbm [shape: f32[64,128], index: 1, kind: input, shape index: {}]   ;;  %s894_s2 = inlined_call_operand.hbm [shape: f32[3,128], index: 2, kind: input, shape index: {}]   ;;  %s895_s3 = inlined_call_operand.hbm [shape: f32[32,128], index: 3, kind: output, shape index: {}]  }
   0x1   :  { %10 = vsyncpa [#allocation3 + $0x1], 0 }
   0x2   :  { %11 = vsyncpa [#allocation6], 0 }
   0x3   :  { %12 = vsyncpa [#allocation4], 0 }
   0x4   :  { %14 = vsyncpa [#allocation4 + $0x1], 0  ;;  %s725_s12 = smov 0   ;;  %s727_s13 = smov 0  }
   0x5   :  { %s729_s14 = smov 0   ;;  %s731_s15 = smov 0  }
   0x6 LB: > { %s746_s16 = sadd.s32 4294967295, %s695_s15   ;;  %s429_s17 = sadd.s32 4294967294, %s695_s15   ;;  %s695_s15 = sphi %s731_s15, %s916_s15   ;;  %s691_s14 = sphi %s729_s14, %s915_s14   ;;  %s687_s13 = sphi %s727_s13, %s914_s13   ;;  %s683_s12 = sphi %s725_s12, %s913_s12  }
   0x7   : > { %p40_p0 = scmp.ne.s32.totalorder %s687_s13, %s683_s12  ;;  %p896_p1 = scmp.eq.s32.totalorder %s746_s16, 0 }
   0x8   : > { %p112_p3 = scmp.eq.s32.totalorder %s429_s17, 3  ;;  %p430_p5 = scmp.ge.s32.totalorder %s695_s15, 1 }
   0x9   : > { %p755_p4 = por %p896_p1, %p40_p0  ;;  %p119_p7 = scmp.lt.s32.totalorder %s695_s15, 5 }
   0xa   : > { %p760_p6 = por %p112_p3, %p40_p0  ;;  %s697_s21 = smov [#allocation5]  }
   0xb   : > { %s900_s18 = scalar_select %p755_p4, 1, 0 }
   0xc   : > { %s901_s19 = scalar_select %p760_p6, 1, 0 }
   0xd   : > { %p765_p8 = pnand %p430_p5, %p119_p7  ;;  %s131_s22 = sshll.u32 %s697_s21, 4  ;;  %s132_s22 = int_to_ptr.vmem [resolvable:$true] %s131_s22 }
   0xe   : > { %s698_s24 = smov [#allocation7]   ;;  %s558_s26 = scalar_lea.vmem %s132_s22, 1024 }
   0xf   : > { %s902_s20 = scalar_select %p765_p8, 1, 0 }
  0x10   : > { %p486_p9 = pneg %p765_p8  ;;  %s145_s25 = sshll.u32 %s698_s24, 4  ;;  %s146_s25 = int_to_ptr.vmem [resolvable:$true] %s145_s25 }
  0x11   : > { %p559_p12 = scmp.ne.s32.totalorder %s132_s22, %s558_s26  ;;  %p566_p3 = scmp.lt.s32.totalorder %s132_s22, %s132_s22 }
  0x12   : > { %p773_p10 = pnand %p486_p9, %p896_p1  ;;  %p567_p5 = scmp.lt.s32.totalorder %s558_s26, %s558_s26 }
  0x14   : > { %p549_p11 = pneg %p773_p10  ;;  %p568_p7 = por %p567_p5, %p566_p3 }
  0x16   : > { %p561_p13 = pnand %p559_p12, %p549_p11 }
  0x18   : > { %p562_p0 = pneg %p561_p13 }
  0x1a   : > { %p569_p9 = pnand %p568_p7, %p562_p0 }
  0x1c   : > { %572 = shalt.err (!%p569_p9)
}
  0x1d   : > { %s699_s27 = smov 128   ;;  %s700_s28 = smov 8  }
  0x1e   : > { %489 = dma.hbm_to_vmem [thread:$0]  (!%p773_p10), %s893_s1, 1024, %s132_s22, [#allocation6], %s699_s27, %s699_s27, %s700_s28  }
  0x1f   : > { %s584_s4 = scalar_lea.vmem %s146_s25, 64  ;;  %p592_p2 = scmp.lt.s32.totalorder %s146_s25, %s146_s25 }
  0x20   : > { %p585_p1 = scmp.ne.s32.totalorder %s146_s25, %s584_s4  ;;  %p593_p6 = scmp.lt.s32.totalorder %s584_s4, %s584_s4 }
  0x22   : > { %p587_p12 = pnand %p585_p1, %p549_p11  ;;  %p594_p3 = por %p593_p6, %p592_p2 }
  0x24   : > { %p588_p13 = pneg %p587_p12 }
  0x26   : > { %p595_p0 = pnand %p594_p3, %p588_p13 }
  0x28   : > { %598 = shalt.err (!%p595_p0)
}
  0x29   : > { %492 = dma.hbm_to_vmem [thread:$0]  (!%p773_p10), %s894_s2, 64, %s146_s25, [#allocation6]  }
  0x2a   : > { %s796_s7 = sadd.s32 1, %s695_s15   ;;  %s27_s8 = sadd.s32 1, %s691_s14 }
  0x2b   : > { %s24_s9 = ssub.s32 %s695_s15, %s796_s7  ;;  %p34_p1 = scmp.ne.s32.totalorder %s691_s14, %s687_s13 }
  0x2c   : > { %p25_p2 = scmp.eq.s32.totalorder %s24_s9, 0  ;;  %p35_p6 = scmp.eq.s32.totalorder %s695_s15, 0 }
  0x2d   : > { %p904_p11 = scmp.eq.s32.totalorder %s746_s16, 3  ;;  %p503_p7 = scmp.lt.s32.totalorder %s695_s15, 4 }
  0x2e   : > { %s812_s11 = scalar_select %p25_p2, %s691_s14, %s27_s8  }
  0x2f   : > { %p806_p5 = por %p904_p11, %p34_p1  ;;  %p36_p9 = por %p35_p6, %p34_p1 }
  0x30   : > { %s156_s17 = sand.u32 1, %s691_s14   ;;  %s435_s22 = sshll.u32 %s695_s15, 7 }
  0x31   : > { %s905_s10 = scalar_select %p806_p5, 1, 0 }
  0x32   : > { %s434_s21 = sshll.u32 %s156_s17, 3  ;;  %s819_s25 = scalar_lea.hbm %s892_s0, %s435_s22 }
  0x33   : > { %s160_s26 = scalar_lea.vmem [#allocation2], %s434_s21  ;;  %p821_p10 = pnand %p503_p7, %p36_p9 }
  0x34   : > { %s167_s27 = sshll.u32 %s160_s26, 4  ;;  %s157_s29 = scalar_lea.sflag [#allocation3], %s156_s17  ;;  %s168_s27 = int_to_ptr.vmem [resolvable:$true] %s167_s27 }
  0x35   : > { %s599_s30 = scalar_lea.hbm %s819_s25, 128  ;;  %p601_p13 = pneg %p821_p10 }
  0x36   : > { %p600_p12 = scmp.ne.s32.totalorder %s819_s25, %s599_s30  ;;  %s604_s6 = scalar_lea.hbm %s892_s0, 512 }
  0x37   : > { %p605_p1 = scmp.lt.s32.totalorder %s819_s25, %s892_s0  ;;  %p606_p2 = scmp.lt.s32.totalorder %s604_s6, %s599_s30 }
  0x38   : > { %p602_p3 = pnand %p601_p13, %p600_p12 }
  0x39   : > { %p607_p6 = por %p606_p2, %p605_p1 }
  0x3a   : > { %p603_p0 = pneg %p602_p3 }
  0x3c   : > { %p608_p11 = pnand %p607_p6, %p603_p0 }
  0x3e   : > { %611 = shalt.err (!%p608_p11)
}
  0x3f   : > { %s612_s21 = scalar_lea.vmem %s168_s27, 128  ;;  %s701_s17 = smov [#allocation2]  }
  0x40   : > { %p613_p7 = scmp.ne.s32.totalorder %s168_s27, %s612_s21  ;;  %s617_s22 = sshll.u32 %s701_s17, 4  ;;  %s618_s22 = int_to_ptr.vmem [resolvable:$false] %s617_s22 }
  0x41   : > { %s619_s23 = scalar_lea.vmem %s618_s22, 256  ;;  %p620_p12 = scmp.lt.s32.totalorder %s168_s27, %s618_s22 }
  0x42   : > { %p615_p9 = pnand %p613_p7, %p601_p13  ;;  %p621_p3 = scmp.lt.s32.totalorder %s619_s23, %s612_s21 }
  0x44   : > { %p616_p5 = pneg %p615_p9  ;;  %p622_p4 = por %p621_p3, %p620_p12 }
  0x46   : > { %p623_p8 = pnand %p622_p4, %p616_p5 }
  0x48   : > { %626 = shalt.err (!%p623_p8)
}
  0x49   : > { %496 = dma.hbm_to_vmem [thread:$0]  (!%p821_p10), %s819_s25, 128, %s168_s27, %s157_s29  }
  0x4a   : > { %p907_p0 = scmp.ne.s32.totalorder %s902_s20, 0 }
  0x4b   : > { %s842_s24 = sand.u32 (!%p907_p0), 1, %s687_s13   ;;  %p908_p4 = scmp.ne.s32.totalorder (!%p907_p0), %s900_s18, 0 }
  0x4c   : > { %176 = sbr.rel (%p907_p0) target bundleno = 480 (0x1e0), region = 32  ;;  %s437_s26 = sshll.u32 (!%p907_p0), %s842_s24, 3 }
  0x4d   : > { %s179_s30 = scalar_lea.sflag (!%p907_p0), [#allocation3], %s842_s24  ;;  %s182_s4 = scalar_lea.vmem (!%p907_p0), [#allocation2], %s437_s26 }
  0x51   : > { %670 = dma.done.wait (%p908_p4), %s179_s30, 128  }
  0x52   : > { %672 = vsyncadd (%p908_p4), %s179_s30, 4294967168  ;;  %p909_p8 = scmp.eq.s32.totalorder %s746_s16, 0 }
  0x54   : > { %674 = dma.done.wait (%p909_p8), [#allocation6], 1088   ;;  %p910_p5 = pmov %p909_p8 }
  0x55   : > { %v702_v0 = vmov 0.0   ;;  %vm703_vm0 = vmmov 0   ;;  %v221_v1 = vld [vmem:[#allocation5 + $0x38] sm:$0xff]  ;;  %v220_v2 = vld [vmem:[#allocation5 + $0x30] sm:$0xff]  ;;  %v219_v3 = vld [vmem:[#allocation5 + $0x28] sm:$0xff]  ;;  %vm227_vm1 = vcmask 523264   ;;  %v223_v10 = vlaneseq }
  0x56   : > { %676 = vsyncadd (%p910_p5), [#allocation6], 4294966208  ;;  %455 = vmatprep.subr.mxu0 %v702_v0  ;;  %471 = vmatprep.mubr.msk.f32.mxu0 %vm703_vm0, %v702_v0  ;;  %v218_v4 = vld [vmem:[#allocation5 + $0x20] sm:$0xff]  ;;  %v217_v5 = vld [vmem:[#allocation5 + $0x18] sm:$0xff]  ;;  %s443_s18 = sshll.u32 %s746_s16, 7  ;;  %s212_s20 = scalar_lea.vmem [#allocation8], %s437_s26 }
  0x57   : > { %456 = vmatpush3.msra.mxu0 %v221_v1  ;;  %v216_v6 = vld [vmem:[#allocation5 + $0x10] sm:$0xff]  ;;  %v215_v7 = vld [vmem:[#allocation5 + $0x8] sm:$0xff]  ;;  %v214_v8 = vld [vmem:[#allocation5] sm:$0xff]  ;;  %v224_v11 = vshrl.u32 %v223_v10, 7  ;;  %s340_s25 = sshll.u32 %s212_s20, 4  ;;  %s338_s29 = scalar_lea.hbm %s895_s3, %s443_s18  ;;  %s341_s25 = int_to_ptr.vmem [resolvable:$true] %s340_s25 }
  0x58   : > { %457 = vmatprep.subr.mxu0 %v702_v0  ;;  %v213_v9 = vld [vmem:[%s182_s4] sm:$0xff]  ;;  %v222_v13 = vld [vmem:[#allocation7] sm:$0x7]  ;;  %s327_s5 = scalar_lea.sflag [#allocation4], %s842_s24  ;;  %s627_s6 = scalar_lea.vmem %s341_s25, 128 }
  0x59   : > { %458 = vmatpush3.msra.mxu0 %v220_v2  ;;  %v225_v12 = vsub.s32 0, %v224_v11  ;;  %v317_v27 = vsub.s32 1, %v224_v11  ;;  %v322_v28 = vsub.s32 2, %v224_v11  ;;  %p628_p10 = scmp.ne.s32.totalorder %s341_s25, %s627_s6  ;;  %p911_p13 = scmp.ne.s32.totalorder %s905_s10, 0 }
  0x5a   : > { %459 = vmatprep.subr.mxu0 %v702_v0  ;;  %s704_s8 = smov [#allocation8]  }
  0x5b   : > { %460 = vmatpush3.msra.mxu0 %v219_v3  ;;  %v226_v14 = vrot.slane %v222_v13, %v225_v12  ;;  %v318_v29 = vrot.slane %v222_v13, %v317_v27  ;;  %v323_v32 = vrot.slane %v222_v13, %v322_v28  ;;  %p629_p1 = pnand %p628_p10, %p911_p13  ;;  %s631_s9 = sshll.u32 %s704_s8, 4  ;;  %s632_s9 = int_to_ptr.vmem [resolvable:$false] %s631_s9 }
  0x5c   : > { %461 = vmatprep.subr.mxu0 %v702_v0  ;;  %s633_s16 = scalar_lea.vmem %s632_s9, 256  ;;  %p634_p6 = scmp.lt.s32.totalorder %s341_s25, %s632_s9 }
  0x5d   : > { %462 = vmatpush3.msra.mxu0 %v218_v4  ;;  %p630_p2 = pneg %p629_p1  ;;  %p635_p11 = scmp.lt.s32.totalorder %s633_s16, %s627_s6 }
  0x5e   : > { %463 = vmatprep.subr.mxu0 %v702_v0 }
  0x5f   : > { %464 = vmatpush3.msra.mxu0 %v217_v5  ;;  %p636_p7 = por %p635_p11, %p634_p6 }
  0x60   : > { %465 = vmatprep.subr.mxu0 %v702_v0 }
  0x61   : > { %466 = vmatpush3.msra.mxu0 %v216_v6  ;;  %p637_p9 = pnand %p636_p7, %p630_p2 }
  0x62   : > { %467 = vmatprep.subr.mxu0 %v702_v0 }
  0x63   : > { %468 = vmatpush3.msra.mxu0 %v215_v7 }
  0x64   : > { %469 = vmatprep.subr.mxu0 %v702_v0 }
  0x65   : > { %470 = vmatpush3.msra.mxu0 %v214_v8 }
  0x66   : > { %472 = vmatmul.mubr.msk.f32.vlgmr.msra.gmra.mxu0 %vm227_vm1, %v213_v9 }
 0x126   : > { %v297_v15 = vpop.f32.mrf.mxu0 }
 0x127   : > { %v298_v16 = vadd.f32 %v297_v15, %v226_v14 }
 0x128   : > { %v473_v17 = vpop.f32.mrf.mxu0 }
 0x129   : > { %301 = vadd.xlane.f32.xlu0 %v298_v16  ;;  %v304_v18 = vmul.f32 %v298_v16, %v298_v16 }
 0x12d   : > { %305 = vadd.xlane.f32.xlu0 %v304_v18 }
 0x1b2   : > { %v302_v19 = vpop.xlane.xlu0 %301 }
 0x1b3   : > { %v303_v20 = vmul.f32 0.03125, %v302_v19 }
 0x1b5   : > { %v308_v22 = vmul.f32 %v303_v20, %v303_v20  ;;  %v311_v30 = vsub.f32 %v298_v16, %v303_v20 }
 0x1b6   : > { %v306_v21 = vpop.xlane.xlu0 %305 }
 0x1b7   : > { %v307_v23 = vmul.f32 0.03125, %v306_v21 }
 0x1b9   : > { %v309_v24 = vsub.f32 %v307_v23, %v308_v22 }
 0x1bb   : > { %v310_v25 = vmax.f32 %v309_v24, 0.0 }
 0x1bd   : > { %v312_v26 = vadd.f32 1e-05, %v310_v25 }
 0x1bf   : > { %545 = vrsqrt.f32 %v312_v26 }
 0x1cc   : > { %v546_v31 = vpop.eup %545 }
 0x1cd   : > { %v314_v33 = vmul.f32 %v546_v31, %v311_v30 }
 0x1cf   : > { %v319_v34 = vmul.f32 %v318_v29, %v314_v33 }
 0x1d1   : > { %v324_v35 = vadd.f32 %v323_v32, %v319_v34 }
 0x1d3   : > { %325 = vst [vmem:[%s212_s20] sm:$0xff] %v324_v35 }
 0x1d4   : > { %640 = shalt.err (!%p637_p9)
}
 0x1d5   : > { %s641_s21 = scalar_lea.hbm %s338_s29, 128  ;;  %s645_s23 = scalar_lea.hbm %s895_s3, 512 }
 0x1d6   : > { %p642_p12 = scmp.ne.s32.totalorder %s338_s29, %s641_s21  ;;  %p646_p4 = scmp.lt.s32.totalorder %s338_s29, %s895_s3 }
 0x1d7   : > { %p647_p8 = scmp.lt.s32.totalorder %s645_s23, %s641_s21 }
 0x1d8   : > { %p643_p3 = pnand %p642_p12, %p911_p13 }
 0x1d9   : > { %p648_p5 = por %p647_p8, %p646_p4 }
 0x1da   : > { %p644_p0 = pneg %p643_p3 }
 0x1dc   : > { %p649_p10 = pnand %p648_p5, %p644_p0 }
 0x1de   : > { %652 = shalt.err (!%p649_p10)
}
 0x1df   : > { %484 = dma.vmem_to_hbm [thread:$0]  (%p911_p13), %s341_s25, 128, %s338_s29, %s327_s5  }
 0x1e0 PF: > { %p506_p1 = scmp.ge.s32.totalorder %s695_s15, 2  ;;  %s352_s30 = sand.u32 1, %s683_s12  }
 0x1e1   : > { %p912_p2 = scmp.ne.s32.totalorder %s901_s19, 0  ;;  %s353_s4 = scalar_lea.sflag [#allocation4], %s352_s30 }
 0x1e3   : > { %p498_p6 = pnand %p506_p1, %p912_p2 }
 0x1e5   : > { %p499_p11 = pneg %p498_p6 }
 0x1e7   : > { %678 = dma.done.wait (%p499_p11), %s353_s4, 128  }
 0x1e8   : > { %680 = vsyncadd (%p499_p11), %s353_s4, 4294967168  ;;  %p17_p7 = scmp.ge.s32.totalorder %s796_s7, 6   ;;  %s913_s12 = smov %s687_s13 }
 0x1e9   : > { %s914_s13 = smov %s691_s14  ;;  %s915_s14 = smov %s812_s11 }
 0x1ea   : > { %s916_s15 = smov %s796_s7  ;;  %19 = sbr.rel (!%p17_p7) target bundleno = 6 (0x6), region = 85 }
 0x1ef   :  { %358 = vsyncpa [#allocation3], 1 }
 0x1f0   :  { %360 = vsyncpa [#allocation3 + $0x1], 1 }
 0x1f1   :  { %361 = vsyncpa [#allocation6], 1 }
 0x1f2   :  { %362 = vsyncpa [#allocation4], 1 }
 0x1f3   :  { %364 = vsyncpa [#allocation4 + $0x1], 1 }

</bundles_post_ra>
